<compile_context>
chip_gen: v7x
topology: tpu7x:2x2x1
jax: 0.10.0
libtpu: 0.0.40
codegen_flags: <defaults>
</compile_context>

<pallas_src>
import jax
import jax.numpy as jnp
from jax.experimental import pallas as pl
from jax.experimental.pallas import tpu as pltpu

_NEG_INF = -1.0e30
_VMEM_LIMIT = 32 * 1024 * 1024  # > v5e's 16 MiB default; well under v7x's 64 MiB/TC


def _round_up(x: int, m: int) -> int:
    return (x + m - 1) // m * m


def _cdiv(a: int, b: int) -> int:
    return (a + b - 1) // b


# --------------------------------------------------------------------------- #
# kernel 1 (large-N path): Wh' = (h @ W^T + b) * F**-0.25, stored in K dtype
# --------------------------------------------------------------------------- #
def _make_linear_kernel(scale: float):
    def kernel(h_ref, w_ref, b_ref, o_ref):
        wh = jnp.dot(h_ref[...], w_ref[...], preferred_element_type=jnp.float32)
        # bias + F**-0.25 score-scale applied exactly once, in f32; single cast.
        o_ref[...] = ((wh + b_ref[...]) * scale).astype(o_ref.dtype)
    return kernel


# --------------------------------------------------------------------------- #
# kernel 2a (small/medium N): fused projection + single-pass softmax attention
#   K/V (= all rows of h) resident in VMEM; no online-softmax, no scratch.
# --------------------------------------------------------------------------- #
def _make_fused_kernel(scale: float, matmul_dtype, need_mask: bool):
    def kernel(hq_ref, hall_ref, w_ref, b_ref, kb_ref, o_ref):
        w = w_ref[...]
        b = b_ref[...]
        h_all = hall_ref[...]
        q_wh = (jnp.dot(hq_ref[...], w, preferred_element_type=jnp.float32) + b) * scale
        k_wh = (jnp.dot(h_all, w, preferred_element_type=jnp.float32) + b) * scale
        # scores: contract last dim of both operands (no explicit transpose)
        s = jax.lax.dot_general(
            q_wh.astype(matmul_dtype), k_wh.astype(matmul_dtype),
            dimension_numbers=(((1,), (1,)), ((), ())),
            preferred_element_type=jnp.float32)                      # (tq, n_pad)
        if need_mask:                      # additive -inf bias on padded key cols
            s = s + kb_ref[...]
        m = jnp.max(s, axis=-1, keepdims=True)
        p = jnp.exp(s - m)
        l = jnp.sum(p, axis=-1, keepdims=True)
        num = jnp.dot(p.astype(matmul_dtype), h_all.astype(matmul_dtype),
                      preferred_element_type=jnp.float32)
        o_ref[...] = (num * pl.reciprocal(l, approx=False)).astype(o_ref.dtype)
    return kernel


# --------------------------------------------------------------------------- #
# kernel 2b (large N): flash-style attention, online softmax over key tiles
# --------------------------------------------------------------------------- #
def _make_flash_kernel(need_mask: bool):
    def kernel(q_ref, k_ref, v_ref, kb_ref, o_ref, m_ref, l_ref, acc_ref):
        ki = pl.program_id(1)

        @pl.when(ki == 0)
        def _init():
            m_ref[...] = jnp.full_like(m_ref, _NEG_INF)
            l_ref[...] = jnp.zeros_like(l_ref)
            acc_ref[...] = jnp.zeros_like(acc_ref)

        s = jax.lax.dot_general(
            q_ref[...], k_ref[...],
            dimension_numbers=(((1,), (1,)), ((), ())),
            preferred_element_type=jnp.float32)                      # (tq, tk)
        if need_mask:                      # single vadd/step; compiled out if no pad
            s = s + kb_ref[...]

        # online softmax (all f32)
        m_prev = m_ref[...]
        m_new = jnp.maximum(m_prev, jnp.max(s, axis=-1, keepdims=True))
        alpha = jnp.exp(m_prev - m_new)
        p = jnp.exp(s - m_new)
        l_ref[...] = alpha * l_ref[...] + jnp.sum(p, axis=-1, keepdims=True)
        acc_ref[...] = alpha * acc_ref[...] + jnp.dot(
            p.astype(v_ref.dtype), v_ref[...], preferred_element_type=jnp.float32)
        m_ref[...] = m_new

        @pl.when(ki == pl.num_programs(1) - 1)
        def _finalize():
            o_ref[...] = (acc_ref[...] *
                          pl.reciprocal(l_ref[...], approx=False)).astype(o_ref.dtype)
    return kernel


# --------------------------------------------------------------------------- #
# tiling helpers
# --------------------------------------------------------------------------- #
def _fused_tiling(n: int, target: int = 256):
    """Minimal-padding row tiling: >=2 tiles when n > target (v7x load balance)."""
    n_tiles = _cdiv(n, target)
    tq = _round_up(_cdiv(n, n_tiles), 8)
    return tq, tq * n_tiles, n_tiles


def _flash_tiling(n: int):
    """Largest tiles whose row padding stays <= ~15% (tk a multiple of tq)."""
    for tq, tk in ((512, 1024), (512, 512), (256, 256), (128, 128)):
        n_pad = _round_up(n, tk)
        if n_pad % tq == 0 and (n_pad - n) <= 0.15 * n:
            return tq, tk, n_pad
    return 128, 128, _round_up(n, 128)


# --------------------------------------------------------------------------- #
# public entry point
# --------------------------------------------------------------------------- #
def attention_layer(h, w_t, b, *, matmul_dtype=jnp.float32, max_resident_rows=2048):
    """AttentionLayer forward.

    h:   (N, F) activations.
    w_t: (F, F) == W.T of nn.Linear(F, F)   (so Wh = h @ w_t + b).
    b:   (F,) or (1, F) bias.
    matmul_dtype: jnp.float32 (accuracy reference) or jnp.bfloat16 (MXU-fast;
                  wh/V stored bf16 in HBM, accumulation + softmax stay f32).
    max_resident_rows: padded-N threshold below which the fused resident-K/V
                  single-pass kernel is used (set 0 to force the flash path).
    """
    N, F = h.shape
    b2 = jnp.reshape(b, (1, F)).astype(jnp.float32)
    w32 = w_t.astype(jnp.float32)
    # e = Wh Wh^T / sqrt(F) == (Wh*F^-0.25)(Wh*F^-0.25)^T -> fold scale once.
    scale = float(F) ** -0.25

    tq_f, n_pad_f, n_tiles_f = _fused_tiling(N)

    # ---------------- small/medium N: fused resident-K/V kernel -------------- #
    if n_pad_f <= max_resident_rows:
        tq, n_pad, n_q = tq_f, n_pad_f, n_tiles_f
        need_mask = n_pad != N
        h_p = h if n_pad == N else jnp.zeros((n_pad, F), h.dtype).at[:N].set(h)
        key_bias = jnp.where(jnp.arange(n_pad)[None, :] < N,
                             0.0, _NEG_INF).astype(jnp.float32)

        out_p = pl.pallas_call(
            _make_fused_kernel(scale, matmul_dtype, need_mask),
            out_shape=jax.ShapeDtypeStruct((n_pad, F), h.dtype),
            grid_spec=pltpu.PrefetchScalarGridSpec(
                num_scalar_prefetch=0,
                grid=(n_q,),
                in_specs=[
                    pl.BlockSpec((tq, F), lambda i: (i, 0)),       # query rows of h
                    pl.BlockSpec((n_pad, F), lambda i: (0, 0)),    # all rows, resident
                    pl.BlockSpec((F, F), lambda i: (0, 0)),        # W^T resident
                    pl.BlockSpec((1, F), lambda i: (0, 0)),        # bias resident
                    pl.BlockSpec((1, n_pad), lambda i: (0, 0)),    # key-pad mask bias
                ],
                out_specs=pl.BlockSpec((tq, F), lambda i: (i, 0)),
            ),
            compiler_params=pltpu.CompilerParams(
                dimension_semantics=("parallel",),
                vmem_limit_bytes=_VMEM_LIMIT),
        )(h_p, h_p, w32, b2, key_bias)
        return out_p[:N]

    # ---------------- large N: projection kernel + flash kernel -------------- #
    tq, tk, n_pad = _flash_tiling(N)
    need_mask = n_pad != N
    h_p = h if n_pad == N else jnp.zeros((n_pad, F), h.dtype).at[:N].set(h)
    key_bias = jnp.where(jnp.arange(n_pad)[None, :] < N,
                         0.0, _NEG_INF).astype(jnp.float32)

    # kernel 1: big row tiles; output stored directly in matmul_dtype so the
    # K stream (re-read n_pad/tq times by kernel 2) is as narrow as possible.
    tq1 = next(t for t in (4096, 2048, 1024, 512, 256, 128) if n_pad % t == 0)
    wh = pl.pallas_call(
        _make_linear_kernel(scale),
        out_shape=jax.ShapeDtypeStruct((n_pad, F), matmul_dtype),
        grid_spec=pltpu.PrefetchScalarGridSpec(
            num_scalar_prefetch=0,
            grid=(n_pad // tq1,),
            in_specs=[
                pl.BlockSpec((tq1, F), lambda i: (i, 0)),
                pl.BlockSpec((F, F), lambda i: (0, 0)),            # W resident
                pl.BlockSpec((1, F), lambda i: (0, 0)),            # b resident
            ],
            out_specs=pl.BlockSpec((tq1, F), lambda i: (i, 0)),
        ),
        compiler_params=pltpu.CompilerParams(
            dimension_semantics=("parallel",),
            vmem_limit_bytes=_VMEM_LIMIT),
    )(h_p, w32, b2)

    v = h_p.astype(matmul_dtype)   # V stream also narrowed in bf16 mode (one cast)

    out_p = pl.pallas_call(
        _make_flash_kernel(need_mask),
        out_shape=jax.ShapeDtypeStruct((n_pad, F), h.dtype),
        grid_spec=pltpu.PrefetchScalarGridSpec(
            num_scalar_prefetch=0,
            grid=(n_pad // tq, n_pad // tk),        # key axis last (reduction)
            in_specs=[
                pl.BlockSpec((tq, F), lambda qi, ki: (qi, 0)),     # Q = Wh'
                pl.BlockSpec((tk, F), lambda qi, ki: (ki, 0)),     # K = Wh'
                pl.BlockSpec((tk, F), lambda qi, ki: (ki, 0)),     # V = h
                pl.BlockSpec((1, tk), lambda qi, ki: (0, ki)),     # key-pad mask bias
            ],
            out_specs=pl.BlockSpec((tq, F), lambda qi, ki: (qi, 0)),
            scratch_shapes=[
                pltpu.VMEM((tq, 1), jnp.float32),      # running max   m
                pltpu.VMEM((tq, 1), jnp.float32),      # running denom l
                pltpu.VMEM((tq, F), jnp.float32),      # running numerator
            ],
        ),
        compiler_params=pltpu.CompilerParams(
            dimension_semantics=("parallel", "arbitrary"),
            vmem_limit_bytes=_VMEM_LIMIT),
    )(wh, wh, v, key_bias)
    return out_p[:N]


# --------------------------------------------------------------------------- #
# reference + test harness
# --------------------------------------------------------------------------- #
def attention_layer_ref(h, w_t, b):
    wh = h @ w_t + jnp.reshape(b, (1, -1))
    e = wh @ wh.T / jnp.sqrt(jnp.float32(wh.shape[-1]))
    return jax.nn.softmax(e, axis=-1) @ h


def _make_inputs(key, n, f):
    k_h, k_w, k_b = jax.random.split(key, 3)
    h = jax.random.normal(k_h, (n, f), dtype=jnp.float32)
    bound = 1.0 / float(f) ** 0.5
    w = jax.random.uniform(k_w, (f, f), jnp.float32, minval=-bound, maxval=bound)
    b = jax.random.uniform(k_b, (1, f), jnp.float32, minval=-bound, maxval=bound)
    return h, w.T, b  # pass weight pre-transposed: Wh = h @ w.T + b


if __name__ == "__main__":
    # 1) Spec-sized check (N=8, F=32): fused resident path, exact f32.
    h, w_t, b = _make_inputs(jax.random.PRNGKey(0), 8, 32)
    out = jax.block_until_ready(attention_layer(h, w_t, b))
    ref = attention_layer_ref(h, w_t, b)
    assert out.shape == (8, 32)
    assert jnp.allclose(out, ref, atol=5e-5, rtol=5e-5), "f32 fused small-shape mismatch"

    # 2) Fused path with 2 query tiles + padded-key mask bias (N=300 -> pad 304).
    h2, w_t2, b2 = _make_inputs(jax.random.PRNGKey(1), 300, 32)
    out2 = jax.block_until_ready(attention_layer(h2, w_t2, b2))
    ref2 = attention_layer_ref(h2, w_t2, b2)
    assert out2.shape == (300, 32)
    assert jnp.allclose(out2, ref2, atol=5e-5, rtol=5e-5), "f32 fused tiled mismatch"

    # 3) Flash (projection + online-softmax) path, forced at small N, exact f32.
    out3 = jax.block_until_ready(attention_layer(h2, w_t2, b2, max_resident_rows=0))
    assert jnp.allclose(out3, ref2, atol=5e-5, rtol=5e-5), "f32 flash mismatch"

    # 4) bf16 storage/MXU mode (perf mode on v5e/v6e/v7x), f32 softmax math.
    out4 = jax.block_until_ready(
        attention_layer(h2, w_t2, b2, matmul_dtype=jnp.bfloat16, max_resident_rows=0))
    assert jnp.allclose(out4, ref2, atol=1e-1, rtol=1e-1), "bf16 smoke mismatch"

    # TODO(synk): the PyTorch module is strictly 2-D (uses .t()); if many such
    # layers run at tiny N, batch them along a leading Squeezed grid axis.
    print("KERNEL_OK")
</pallas_src>

<mosaic_0001>
module attributes {stable_mosaic.version = 11 : i64} {
  func.func @kernel(%arg0: i32, %arg1: memref<8x32xf32, #tpu.memory_space<vmem>>, %arg2: memref<8x32xf32, #tpu.memory_space<vmem>>, %arg3: memref<32x32xf32, #tpu.memory_space<vmem>>, %arg4: memref<1x32xf32, #tpu.memory_space<vmem>>, %arg5: memref<1x8xf32, #tpu.memory_space<vmem>>, %arg6: memref<8x32xf32, #tpu.memory_space<vmem>>) attributes {dimension_semantics = [#tpu.dimension_semantics<parallel>], iteration_bounds = array<i64: 1>, scalar_prefetch = 0 : i64, scratch_operands = 0 : i64, tpu.core_type = #tpu.core_type<tc>, window_params = [{transform_indices = @transform_0, window_bounds = array<i64: 8, 32>}, {pipeline_mode = #tpu.pipeline_mode<synchronous>, transform_indices = @transform_1, window_bounds = array<i64: 8, 32>}, {pipeline_mode = #tpu.pipeline_mode<synchronous>, transform_indices = @transform_2, window_bounds = array<i64: 32, 32>}, {pipeline_mode = #tpu.pipeline_mode<synchronous>, transform_indices = @transform_3, window_bounds = array<i64: 1, 32>}, {pipeline_mode = #tpu.pipeline_mode<synchronous>, transform_indices = @transform_4, window_bounds = array<i64: 1, 8>}, {transform_indices = @transform_5, window_bounds = array<i64: 8, 32>}]} {
    %c0 = arith.constant 0 : index
    %c0_0 = arith.constant 0 : index
    %0 = vector.load %arg3[%c0, %c0_0] : memref<32x32xf32, #tpu.memory_space<vmem>>, vector<32x32xf32>
    %c0_1 = arith.constant 0 : index
    %c0_2 = arith.constant 0 : index
    %1 = vector.load %arg4[%c0_1, %c0_2] : memref<1x32xf32, #tpu.memory_space<vmem>>, vector<1x32xf32>
    %c0_3 = arith.constant 0 : index
    %c0_4 = arith.constant 0 : index
    %2 = vector.load %arg2[%c0_3, %c0_4] : memref<8x32xf32, #tpu.memory_space<vmem>>, vector<8x32xf32>
    %c0_5 = arith.constant 0 : index
    %c0_6 = arith.constant 0 : index
    %3 = vector.load %arg1[%c0_5, %c0_6] : memref<8x32xf32, #tpu.memory_space<vmem>>, vector<8x32xf32>
    %cst = arith.constant dense<0.000000e+00> : vector<8x32xf32>
    %4 = tpu.matmul %3, %0, %cst {dimension_numbers = #tpu.dot_dimension_numbers<[1], [0], [0], [1], [0, 0, 1, 1], [], []>} : vector<8x32xf32>, vector<32x32xf32>, vector<8x32xf32> -> vector<8x32xf32>
    %5 = vector.broadcast %1 : vector<1x32xf32> to vector<8x32xf32>
    %6 = arith.addf %4, %5 : vector<8x32xf32>
    %cst_7 = arith.constant 0.420448214 : f32
    %7 = vector.broadcast %cst_7 : f32 to vector<8x32xf32>
    %8 = arith.mulf %6, %7 : vector<8x32xf32>
    %cst_8 = arith.constant dense<0.000000e+00> : vector<8x32xf32>
    %9 = tpu.matmul %2, %0, %cst_8 {dimension_numbers = #tpu.dot_dimension_numbers<[1], [0], [0], [1], [0, 0, 1, 1], [], []>} : vector<8x32xf32>, vector<32x32xf32>, vector<8x32xf32> -> vector<8x32xf32>
    %10 = vector.broadcast %1 : vector<1x32xf32> to vector<8x32xf32>
    %11 = arith.addf %9, %10 : vector<8x32xf32>
    %cst_9 = arith.constant 0.420448214 : f32
    %12 = vector.broadcast %cst_9 : f32 to vector<8x32xf32>
    %13 = arith.mulf %11, %12 : vector<8x32xf32>
    %cst_10 = arith.constant dense<0.000000e+00> : vector<8x8xf32>
    %14 = tpu.matmul %8, %13, %cst_10 {dimension_numbers = #tpu.dot_dimension_numbers<[1], [1], [0], [0], [0, 0, 1, 0], [], []>} : vector<8x32xf32>, vector<8x32xf32>, vector<8x8xf32> -> vector<8x8xf32>
    %cst_11 = arith.constant dense<0xFF800000> : vector<8xf32>
    %15 = vector.multi_reduction <maximumf>, %14, %cst_11 [1] : vector<8x8xf32> to vector<8xf32>
    %16 = vector.shape_cast %15 : vector<8xf32> to vector<8x1xf32>
    %17 = vector.broadcast %16 : vector<8x1xf32> to vector<8x8xf32>
    %18 = arith.subf %14, %17 : vector<8x8xf32>
    %19 = math.exp %18 : vector<8x8xf32>
    %cst_12 = arith.constant dense<0.000000e+00> : vector<8xf32>
    %20 = vector.multi_reduction <add>, %19, %cst_12 [1] : vector<8x8xf32> to vector<8xf32>
    %21 = vector.shape_cast %20 : vector<8xf32> to vector<8x1xf32>
    %cst_13 = arith.constant dense<0.000000e+00> : vector<8x32xf32>
    %22 = tpu.matmul %19, %2, %cst_13 {dimension_numbers = #tpu.dot_dimension_numbers<[1], [0], [0], [1], [0, 0, 1, 1], [], []>} : vector<8x8xf32>, vector<8x32xf32>, vector<8x32xf32> -> vector<8x32xf32>
    %23 = tpu.reciprocal %21 : vector<8x1xf32> -> vector<8x1xf32>
    %24 = vector.broadcast %23 : vector<8x1xf32> to vector<8x32xf32>
    %25 = arith.mulf %22, %24 : vector<8x32xf32>
    %c0_14 = arith.constant 0 : index
    %c0_15 = arith.constant 0 : index
    %26 = vector.load %arg6[%c0_14, %c0_15] : memref<8x32xf32, #tpu.memory_space<vmem>>, vector<8x32xf32>
    tpu.vector_store %arg6[%c0_14, %c0_15], %25 {strides = array<i32>} : memref<8x32xf32, #tpu.memory_space<vmem>>, vector<8x32xf32>,
    return
  }
  func.func @transform_0(%arg0: i32) -> (i32, i32) {
    %c0_i32 = arith.constant 0 : i32
    %c0_i32_0 = arith.constant 0 : i32
    return %arg0, %c0_i32 : i32, i32
  }
  func.func @transform_1(%arg0: i32) -> (i32, i32) {
    %c0_i32 = arith.constant 0 : i32
    %c0_i32_0 = arith.constant 0 : i32
    %c0_i32_1 = arith.constant 0 : i32
    return %c0_i32, %c0_i32_0 : i32, i32
  }
  func.func @transform_2(%arg0: i32) -> (i32, i32) {
    %c0_i32 = arith.constant 0 : i32
    %c0_i32_0 = arith.constant 0 : i32
    %c0_i32_1 = arith.constant 0 : i32
    return %c0_i32, %c0_i32_0 : i32, i32
  }
  func.func @transform_3(%arg0: i32) -> (i32, i32) {
    %c0_i32 = arith.constant 0 : i32
    %c0_i32_0 = arith.constant 0 : i32
    %c0_i32_1 = arith.constant 0 : i32
    return %c0_i32, %c0_i32_0 : i32, i32
  }
  func.func @transform_4(%arg0: i32) -> (i32, i32) {
    %c0_i32 = arith.constant 0 : i32
    %c0_i32_0 = arith.constant 0 : i32
    %c0_i32_1 = arith.constant 0 : i32
    return %c0_i32, %c0_i32_0 : i32, i32
  }
  func.func @transform_5(%arg0: i32) -> (i32, i32) {
    %c0_i32 = arith.constant 0 : i32
    %c0_i32_0 = arith.constant 0 : i32
    return %arg0, %c0_i32 : i32, i32
  }
}

</mosaic_0001>

<bundles_post_ra>
// kernel: tpu_custom_call.1
= control target key start
LH: loop header
LB: loop body
LE: loop exit
PB: predicated region body
PF: predicated region fallthrough
CT: control target
= control target key end

     0   :  { %10 = vsyncpa [#allocation3], 0  ;;  %s668_s0 = inlined_call_operand.hbm [shape: f32[8,32], index: 0, kind: input, shape index: {}]   ;;  %s669_s1 = inlined_call_operand.hbm [shape: f32[8,32], index: 1, kind: input, shape index: {}]   ;;  %s670_s2 = inlined_call_operand.hbm [shape: f32[32,32], index: 2, kind: input, shape index: {}]   ;;  %s671_s3 = inlined_call_operand.vmem [shape: f32[1,32], index: 3, kind: input, shape index: {}]   ;;  %s672_s4 = inlined_call_operand.vmem [shape: f32[1,8], index: 4, kind: input, shape index: {}]   ;;  %s673_s5 = inlined_call_operand.hbm [shape: f32[8,32], index: 5, kind: output, shape index: {}]  }
   0x1   :  { %11 = vsyncpa [#allocation6], 0 }
   0x2   :  { %12 = vsyncpa [#allocation4], 0  ;;  %s569_s18 = smov [#allocation5]   ;;  %s570_s20 = smov [#allocation2]  }
   0x3   :  { %s29_s19 = sshll.u32 %s569_s18, 4  ;;  %s19_s21 = sshll.u32 %s570_s20, 4  ;;  %s30_s19 = int_to_ptr.vmem [resolvable:$true] %s29_s19  ;;  %s20_s21 = int_to_ptr.vmem [resolvable:$true] %s19_s21 }
   0x4   :  { %s475_s24 = scalar_lea.hbm %s669_s1, 128 }
   0x5   :  { %p476_p0 = scmp.ne.s32.totalorder %s669_s1, %s475_s24  ;;  %p479_p1 = scmp.lt.u32.totalorder %s475_s24, %s669_s1 }
   0x7   :  { %p481_p2 = pnand %p479_p1, %p476_p0 }
   0x9   :  { %484 = shalt.err (!%p481_p2)
}
   0xa   :  { %s485_s28 = scalar_lea.vmem %s30_s19, 128  ;;  %p490_p4 = scmp.lt.s32.totalorder %s30_s19, %s30_s19 }
   0xb   :  { %p486_p3 = scmp.ne.s32.totalorder %s30_s19, %s485_s28  ;;  %p491_p5 = scmp.lt.s32.totalorder %s485_s28, %s485_s28 }
   0xd   :  { %p492_p6 = por %p491_p5, %p490_p4 }
   0xf   :  { %p493_p7 = pnand %p492_p6, %p486_p3 }
  0x11   :  { %496 = shalt.err (!%p493_p7)
}
  0x12   :  { %32 = dma.hbm_to_vmem [thread:$0]  %s669_s1, 128, %s30_s19, [#allocation6]  }
  0x13   :  { %s497_s8 = scalar_lea.hbm %s668_s0, 128 }
  0x14   :  { %p498_p8 = scmp.ne.s32.totalorder %s668_s0, %s497_s8  ;;  %p501_p9 = scmp.lt.u32.totalorder %s497_s8, %s668_s0 }
  0x16   :  { %p503_p10 = pnand %p501_p9, %p498_p8 }
  0x18   :  { %506 = shalt.err (!%p503_p10)
}
  0x19   :  { %s507_s13 = scalar_lea.vmem %s20_s21, 128  ;;  %p512_p12 = scmp.lt.s32.totalorder %s20_s21, %s20_s21 }
  0x1a   :  { %p508_p11 = scmp.ne.s32.totalorder %s20_s21, %s507_s13  ;;  %p513_p13 = scmp.lt.s32.totalorder %s507_s13, %s507_s13 }
  0x1c   :  { %p514_p0 = por %p513_p13, %p512_p12 }
  0x1e   :  { %p515_p1 = pnand %p514_p0, %p508_p11 }
  0x20   :  { %518 = shalt.err (!%p515_p1)
}
  0x21   :  { %22 = dma.hbm_to_vmem [thread:$0]  %s668_s0, 128, %s20_s21, [#allocation3]  }
  0x22   :  { %s571_s15 = smov [#allocation7]   ;;  %s519_s19 = scalar_lea.hbm %s670_s2, 512 }
  0x23   :  { %s38_s16 = sshll.u32 %s571_s15, 4  ;;  %p520_p2 = scmp.ne.s32.totalorder %s670_s2, %s519_s19  ;;  %s39_s16 = int_to_ptr.vmem [resolvable:$true] %s38_s16 }
  0x24   :  { %p523_p3 = scmp.lt.u32.totalorder %s519_s19, %s670_s2 }
  0x26   :  { %p525_p4 = pnand %p523_p3, %p520_p2 }
  0x28   :  { %528 = shalt.err (!%p525_p4)
}
  0x29   :  { %s529_s25 = scalar_lea.vmem %s39_s16, 512  ;;  %p534_p6 = scmp.lt.s32.totalorder %s39_s16, %s39_s16 }
  0x2a   :  { %p530_p5 = scmp.ne.s32.totalorder %s39_s16, %s529_s25  ;;  %p535_p7 = scmp.lt.s32.totalorder %s529_s25, %s529_s25 }
  0x2c   :  { %p536_p8 = por %p535_p7, %p534_p6 }
  0x2e   :  { %p537_p9 = pnand %p536_p8, %p530_p5 }
  0x30   :  { %540 = shalt.err (!%p537_p9)
}
  0x31   :  { %s572_s0 = smov 128   ;;  %s573_s21 = smov 8  }
  0x32   :  { %44 = dma.hbm_to_vmem [thread:$0]  %s670_s2, 512, %s39_s16, [#allocation6], %s572_s0, %s572_s0, %s573_s21  }
  0x33   :  { %563 = dma.done.wait [#allocation3], 128  }
  0x34   :  { %564 = vsyncadd [#allocation3], 4294967168 }
  0x35   :  { %565 = dma.done.wait [#allocation6], 640  }
  0x36   :  { %566 = vsyncadd [#allocation6], 4294966656  ;;  %v574_v0 = vmov 0.0|0.0   ;;  %vm575_vm0 = vmmov 0   ;;  %v576_v1 = vmov 0.0   ;;  %v58_v2 = vld [vmem:[#allocation7] sm:$0xff] }
  0x37   :  { %456 = vmatprep.subr.bf16.mxu1 %v574_v0  ;;  %450 = vmatprep.subr.bf16.mxu0 %v574_v0  ;;  %v59_v3 = vld [vmem:[#allocation7 + $0x8] sm:$0xff]  ;;  %v60_v4 = vld [vmem:[#allocation7 + $0x10] sm:$0xff]  ;;  %v61_v6 = vld [vmem:[#allocation7 + $0x18] sm:$0xff]  ;;  %vm71_vm1 = vcmask 261120   ;;  %vm296_vm2 = vcmask 64512  }
  0x38   :  { %437 = vmatprep.mubr.msk.f32.mxu1 %vm575_vm0, %v576_v1  ;;  %426 = vmatprep.mubr.msk.f32.mxu0 %vm575_vm0, %v576_v1  ;;  %v451_v5 = vpack.c.bf16 %v59_v3, %v58_v2  ;;  %v454_v7 = vpack.c.bf16 %v61_v6, %v60_v4  ;;  %v63_v8 = vld [vmem:[#allocation5] sm:$0xff]  ;;  %v64_v9 = vld [vmem:[#allocation2] sm:$0xff] }
  0x39   :  { %v398_v10 = vld [vmem:[%s671_s3] ss:$0 sm:$0xff]  ;;  %s577_s3 = smov [#allocation8]  }
  0x3a   :  { %458 = vmatpush3.bf16.msra.mxu1 %v451_v5  ;;  %452 = vmatpush3.bf16.msra.mxu0 %v451_v5  ;;  %s388_s28 = sshll.u32 %s577_s3, 4  ;;  %s389_s28 = int_to_ptr.vmem [resolvable:$true] %s388_s28 }
  0x3b   :  { %459 = vmatprep.subr.bf16.mxu1 %v574_v0  ;;  %453 = vmatprep.subr.bf16.mxu0 %v574_v0  ;;  %s541_s29 = scalar_lea.vmem %s389_s28, 128  ;;  %p546_p11 = scmp.lt.s32.totalorder %s389_s28, %s389_s28 }
  0x3c   :  { %p542_p10 = scmp.ne.s32.totalorder %s389_s28, %s541_s29  ;;  %p547_p12 = scmp.lt.s32.totalorder %s541_s29, %s541_s29 }
  0x3e   :  { %461 = vmatpush3.bf16.msra.mxu1 %v454_v7  ;;  %455 = vmatpush3.bf16.msra.mxu0 %v454_v7  ;;  %p548_p13 = por %p547_p12, %p546_p11 }
  0x3f   :  { %440 = vmatprep.subr.mxu0 %v576_v1  ;;  %445 = vmatprep.subr.mxu1 %v576_v1 }
  0x40   :  { %p549_p0 = pnand %p548_p13, %p542_p10 }
  0x41   :  { %438 = vmatmul.mubr.msk.f32.vlgmr.msra.gmra.mrb[0].mxu1 %vm71_vm1, %v63_v8  ;;  %427 = vmatmul.mubr.msk.f32.vlgmr.msra.gmra.mrb[0].mxu0 %vm71_vm1, %v64_v9 }
  0x42   :  { %442 = vmatprep.mubr.msk.f32.mxu0 %vm575_vm0, %v576_v1  ;;  %446 = vmatpush3.msra.mxu1 %v63_v8 }
  0x43   :  { %447 = vmatprep.mubr.msk.f32.mxu1 %vm575_vm0, %v576_v1 }
 0x114   :  { %v215_v11 = vpop.f32.mrb[0].mxu1  ;;  %v141_v12 = vpop.f32.mrb[0].mxu0 }
 0x115   :  { %v216_v13 = vadd.f32 %v398_v10, %v215_v11  ;;  %v439_v14 = vpop.f32.mrb[1].mxu1  ;;  %v142_v15 = vadd.f32 %v398_v10, %v141_v12  ;;  %v428_v16 = vpop.f32.mrb[1].mxu0 }
 0x117   :  { %v219_v17 = vmul.f32 0.4204482, %v216_v13  ;;  %v145_v18 = vmul.f32 0.4204482, %v142_v15 }
 0x119   :  { %441 = vmatpush3.xpose.msk.msra.mxu0 %vm71_vm1, %v219_v17 }
 0x11c   :  { %443 = vmatmul.mubr.msk.f32.vlgmr.msra.gmra.mrb[2].mxu0 %vm71_vm1, %v145_v18 }
 0x1ef   :  { %v292_v19 = vpop.f32.mrb[2].mxu0 }
 0x1f0   :  { %v444_v20 = vpop.f32.mrb[3].mxu0  ;;  %v297_v21 = vsel %vm296_vm2, %v292_v19, -inf }
 0x1f1   :  { %298 = vmax.xlane.f32.xlu0 %v297_v21 }
 0x27e   :  { %v299_v22 = vpop.xlane.xlu0 %298 }
 0x27f   :  { %v300_v23 = vsub.f32 %v292_v19, %v299_v22 }
 0x281   :  { %v301_v24 = vmul.f32 1.442695, %v300_v23 }
 0x283   :  { %471 = vpow2.f32 %v301_v24 }
 0x28d   :  { %v472_v25 = vpop.eup %471 }
 0x28e   :  { %448 = vmatmul.mubr.msk.f32.vlgmr.msra.gmra.mrb[2].mxu1 %vm296_vm2, %v472_v25  ;;  %v303_v26 = vsel %vm296_vm2, %v472_v25, 0.0 }
 0x28f   :  { %304 = vadd.xlane.f32.xlu0 %v303_v26 }
 0x31c   :  { %v305_v27 = vpop.xlane.xlu0 %304 }
 0x31d   :  { %473 = vrcp.f32 %v305_v27 }
 0x327   :  { %v474_v28 = vpop.eup %473 }
 0x361   :  { %v375_v29 = vpop.f32.mrb[2].mxu1 }
 0x362   :  { %v380_v30 = vmul.f32 %v474_v28, %v375_v29  ;;  %v449_v31 = vpop.f32.mrb[3].mxu1 }
 0x364   :  { %381 = vst.msk [vmem:[#allocation8] sm:$0xff] %vm71_vm1, %v380_v30 }
 0x365   :  { %552 = shalt.err (!%p549_p0)
}
 0x366   :  { %s553_s7 = scalar_lea.hbm %s673_s5, 128 }
 0x367   :  { %p554_p1 = scmp.ne.s32.totalorder %s673_s5, %s553_s7  ;;  %p557_p2 = scmp.lt.u32.totalorder %s553_s7, %s673_s5 }
 0x369   :  { %p559_p3 = pnand %p557_p2, %p554_p1 }
 0x36b   :  { %562 = shalt.err (!%p559_p3)
}
 0x36c   :  { %391 = dma.vmem_to_hbm [thread:$0]  %s389_s28, 128, %s673_s5, [#allocation4]  }
 0x36d   :  { %567 = dma.done.wait [#allocation4], 128  }
 0x36e   :  { %568 = vsyncadd [#allocation4], 4294967168 }
 0x36f   :  { %395 = vsyncpa [#allocation3], 1 }
 0x370   :  { %396 = vsyncpa [#allocation6], 1 }
 0x371   :  { %397 = vsyncpa [#allocation4], 1 }

</bundles_post_ra>
